<compile_context>
chip_gen: v5e
topology: v5e:2x2
jax: 0.10.0
libtpu: 0.0.40
codegen_flags: <defaults>
</compile_context>

<pallas_src>
import functools
from math import sqrt

import jax
import jax.numpy as jnp
from jax import lax
from jax.experimental import pallas as pl
from jax.experimental.pallas import tpu as pltpu


# ----------------------------------------------------------------------------------
# tile / layout pickers
# ----------------------------------------------------------------------------------
def _pick_tile(n, cap):
    """Largest tile <= cap dividing n, preferring multiples of 128/16/8; n if n <= cap."""
    if n <= cap:
        return n
    for step in (128, 16, 8):
        start = (cap // step) * step
        for t in range(start, step - 1, -step):
            if n % t == 0:
                return t
    # TODO(synk): pad + masked tail tile instead of a full-dim fallback.
    return n


def _pick_col_tile(n, cap):
    """Column tile: multiple of 128 (lane-dense) dividing n, or the full width."""
    if n <= cap:
        return n
    start = (cap // 128) * 128
    for t in range(start, 127, -128):
        if n % t == 0:
            return t
    return n


def _heads_per_group(num_heads, head_dim):
    """Heads packed per attention block so the block's last dim is >=128 lanes (or full E)."""
    if head_dim % 128 == 0:
        return 1
    if 128 % head_dim == 0:
        g = 128 // head_dim
        if num_heads % g == 0:
            return g
    return num_heads  # fallback: whole-E blocks (always layout-legal)


# ----------------------------------------------------------------------------------
# Shared projection kernel:  y = cast_bf16(x) @ W^T + b     (f32 accumulation)
#   x_ref: (TM, K) f32 or bf16   w_ref: (TN, K) bf16   b_ref: (1, TN) f32
# ----------------------------------------------------------------------------------
def _linear_kernel(x_ref, w_ref, b_ref, o_ref):
    x = x_ref[...].astype(jnp.bfloat16)          # fused f32->bf16 cast (no-op if already bf16)
    acc = lax.dot_general(x, w_ref[...], (((1,), (1,)), ((), ())),
                          preferred_element_type=jnp.float32)
    o_ref[...] = (acc + b_ref[...]).astype(o_ref.dtype)


def _input_projection(x2, w_in_b16, b_in_3d, *, tile_m, gd):
    """x2 (rows, E) f32 -> (3E//gd, rows, gd) bf16, column-block-major."""
    rows, e = x2.shape
    ncb = w_in_b16.shape[0] // gd
    return pl.pallas_call(
        _linear_kernel,
        out_shape=jax.ShapeDtypeStruct((ncb, rows, gd), jnp.bfloat16),
        grid_spec=pltpu.PrefetchScalarGridSpec(
            num_scalar_prefetch=0,
            grid=(rows // tile_m, ncb),
            in_specs=[
                pl.BlockSpec((tile_m, e), lambda i, j: (i, 0)),        # x row tile (f32)
                pl.BlockSpec((gd, e), lambda i, j: (j, 0)),            # weight rows for col block
                pl.BlockSpec((None, 1, gd), lambda i, j: (j, 0, 0)),   # bias slice
            ],
            out_specs=pl.BlockSpec((None, tile_m, gd), lambda i, j: (j, i, 0)),
        ),
        compiler_params=pltpu.CompilerParams(
            dimension_semantics=("parallel", "parallel")),
    )(x2, w_in_b16, b_in_3d)


def _output_projection(attn2, w_out_b16, b_out_2d, *, tile_m, tile_n, out_dtype):
    """attn2 (rows, E) bf16 -> (rows, E) out_dtype."""
    rows, e = attn2.shape
    return pl.pallas_call(
        _linear_kernel,
        out_shape=jax.ShapeDtypeStruct((rows, e), out_dtype),
        grid_spec=pltpu.PrefetchScalarGridSpec(
            num_scalar_prefetch=0,
            grid=(rows // tile_m, e // tile_n),
            in_specs=[
                pl.BlockSpec((tile_m, e), lambda i, j: (i, 0)),
                pl.BlockSpec((tile_n, e), lambda i, j: (j, 0)),
                pl.BlockSpec((1, tile_n), lambda i, j: (0, j)),
            ],
            out_specs=pl.BlockSpec((tile_m, tile_n), lambda i, j: (i, j)),
        ),
        compiler_params=pltpu.CompilerParams(
            dimension_semantics=("parallel", "parallel")),
    )(attn2, w_out_b16, b_out_2d)


# ----------------------------------------------------------------------------------
# Flash attention over a (batch*head_group, q-tile, kv-tile) grid.
#   q_ref: (TQ, G*D)  k_ref/v_ref: (TK, G*D)  o_ref: (TQ, G*D)
#   scratch: m (TQ, G), l (TQ, G), acc (TQ, G*D) -- all f32, persist across kv tiles.
# ----------------------------------------------------------------------------------
def _attn_kernel(q_ref, k_ref, v_ref, o_ref, m_sc, l_sc, acc_sc, *, scale, g, d):
    ki = pl.program_id(2)

    @pl.when(ki == 0)
    def _():
        m_sc[...] = jnp.full_like(m_sc, -jnp.inf)
        l_sc[...] = jnp.zeros_like(l_sc)
        acc_sc[...] = jnp.zeros_like(acc_sc)

    q = q_ref[...]                                   # (TQ, G*D) bf16
    k = k_ref[...]                                   # (TK, G*D) bf16
    v = v_ref[...]                                   # (TK, G*D) bf16

    for h in range(g):                               # static loop over packed heads
        lo = h * d
        qh = q[:, lo:lo + d]
        kh = k[:, lo:lo + d]
        vh = v[:, lo:lo + d]
        # Q K^T without materializing a transpose of K; scale applied in f32.
        s = lax.dot_general(qh, kh, (((1,), (1,)), ((), ())),
                            preferred_element_type=jnp.float32) * scale   # (TQ, TK)
        m_prev = m_sc[:, h:h + 1]
        l_prev = l_sc[:, h:h + 1]
        m_new = jnp.maximum(m_prev, jnp.max(s, axis=-1, keepdims=True))
        alpha = jnp.exp(m_prev - m_new)
        p = jnp.exp(s - m_new)                                            # (TQ, TK) f32
        l_sc[:, h:h + 1] = alpha * l_prev + jnp.sum(p, axis=-1, keepdims=True)
        pv = jnp.dot(p.astype(vh.dtype), vh,
                     preferred_element_type=jnp.float32)                  # (TQ, D)
        acc_sc[:, lo:lo + d] = alpha * acc_sc[:, lo:lo + d] + pv
        m_sc[:, h:h + 1] = m_new

    @pl.when(ki == pl.num_programs(2) - 1)
    def _():
        outs = []
        for h in range(g):
            lo = h * d
            outs.append(acc_sc[:, lo:lo + d] / l_sc[:, h:h + 1])          # exact divide
        o_ref[...] = jnp.concatenate(outs, axis=-1).astype(o_ref.dtype)   # lane-dense store


def _attention(qkv, *, batch, seq, n_hg, g, d, tile_q, tile_k, scale):
    """qkv (3*n_hg, B*S, G*D) bf16 -> attn (B*S, E) bf16 (head-major columns)."""
    rows = batch * seq
    gd = g * d
    nq = seq // tile_q
    nk = seq // tile_k
    kern = functools.partial(_attn_kernel, scale=scale, g=g, d=d)

    def q_map(t, qi, ki):
        return (t % n_hg, (t // n_hg) * nq + qi, 0)

    def k_map(t, qi, ki):
        return (n_hg + t % n_hg, (t // n_hg) * nk + ki, 0)

    def v_map(t, qi, ki):
        return (2 * n_hg + t % n_hg, (t // n_hg) * nk + ki, 0)

    def o_map(t, qi, ki):
        return ((t // n_hg) * nq + qi, t % n_hg)

    return pl.pallas_call(
        kern,
        out_shape=jax.ShapeDtypeStruct((rows, n_hg * gd), jnp.bfloat16),
        grid_spec=pltpu.PrefetchScalarGridSpec(
            num_scalar_prefetch=0,
            grid=(batch * n_hg, nq, nk),
            in_specs=[
                pl.BlockSpec((None, tile_q, gd), q_map),   # Q tile (col block hg)
                pl.BlockSpec((None, tile_k, gd), k_map),   # K tile (col block n_hg + hg)
                pl.BlockSpec((None, tile_k, gd), v_map),   # V tile (col block 2*n_hg + hg)
            ],
            out_specs=pl.BlockSpec((tile_q, gd), o_map),
            scratch_shapes=[
                pltpu.VMEM((tile_q, g), jnp.float32),      # running max  m
                pltpu.VMEM((tile_q, g), jnp.float32),      # running sum  l
                pltpu.VMEM((tile_q, gd), jnp.float32),     # running acc
            ],
        ),
        compiler_params=pltpu.CompilerParams(
            dimension_semantics=("parallel", "parallel", "arbitrary")),
    )(qkv, qkv, qkv)


# ----------------------------------------------------------------------------------
# Full forward
# ----------------------------------------------------------------------------------
def multi_head_attention(x, w_in, b_in, w_out, b_out, *, num_heads,
                         out_dtype=jnp.float32):
    """x: (B, S, E); w_in: (3E, E); b_in: (3E,); w_out: (E, E); b_out: (E,)."""
    B, S, E = x.shape
    H = num_heads
    D = E // H
    assert D * H == E

    G = _heads_per_group(H, D)       # heads packed per attention block
    gd = G * D                       # lane width of Q/K/V/O blocks
    n_hg = H // G
    rows = B * S

    # One-time bf16 weight casts; weights keep their (out, in) layout (no transpose).
    w_in_b = w_in.astype(jnp.bfloat16)                       # (3E, E)
    w_out_b = w_out.astype(jnp.bfloat16)                     # (E, E)
    b_in_3d = b_in.astype(jnp.float32).reshape(3 * n_hg, 1, gd)
    b_out_2d = b_out.astype(jnp.float32).reshape(1, E)

    # Tile picks: keep the (tile_m, E) f32 row tile around <= 4 MiB, cap 512.
    row_cap = min(512, max(16, ((4 << 20) // (4 * E)) // 16 * 16))
    tile_m = _pick_tile(rows, row_cap)
    tile_q = _pick_tile(S, 256)
    tile_k = _pick_tile(S, 512)
    tile_n_out = _pick_col_tile(E, 512)

    x2 = x.reshape(rows, E)          # f32; bf16 cast is fused into the projection kernel

    # 1) input projection -> column-block-major (3*n_hg, rows, gd) bf16 (no later transpose)
    qkv = _input_projection(x2, w_in_b, b_in_3d, tile_m=tile_m, gd=gd)

    # 2) flash attention, output written directly in (rows, E) head-major layout
    attn = _attention(qkv, batch=B, seq=S, n_hg=n_hg, g=G, d=D,
                      tile_q=tile_q, tile_k=tile_k, scale=1.0 / sqrt(D))

    # 3) output projection
    y = _output_projection(attn, w_out_b, b_out_2d, tile_m=tile_m,
                           tile_n=tile_n_out, out_dtype=out_dtype)
    return y.reshape(B, S, E)


# ----------------------------------------------------------------------------------
# Pure-JAX f32 reference (mirrors the PyTorch forward with mask=None)
# ----------------------------------------------------------------------------------
def _reference(x, w_in, b_in, w_out, b_out, *, num_heads):
    B, S, E = x.shape
    D = E // num_heads
    inp = jnp.einsum('bse,oe->bso', x, w_in) + b_in
    q, k, v = jnp.split(inp, 3, axis=-1)
    q = q.reshape(B, S, num_heads, D)
    k = k.reshape(B, S, num_heads, D)
    v = v.reshape(B, S, num_heads, D)
    s = jnp.einsum('bshd,brhd->bhsr', q, k) * (1.0 / sqrt(D))
    p = jax.nn.softmax(s, axis=-1)
    attn = jnp.einsum('bhsr,brhd->bshd', p, v).reshape(B, S, E)
    return jnp.einsum('bse,oe->bso', attn, w_out) + b_out


if __name__ == "__main__":
    batch_size, seq_len, embed_dim, num_heads = 2, 8, 32, 4

    key = jax.random.PRNGKey(0)
    kx, kwi, kbi, kwo, kbo = jax.random.split(key, 5)

    x = jax.random.normal(kx, (batch_size, seq_len, embed_dim), dtype=jnp.float32)
    # nn.Linear(embed_dim, 3*embed_dim): weight (3E, E), bias (3E,)
    w_in = jax.random.normal(kwi, (3 * embed_dim, embed_dim), dtype=jnp.float32) * 0.1
    b_in = jax.random.normal(kbi, (3 * embed_dim,), dtype=jnp.float32) * 0.1
    # nn.Linear(embed_dim, embed_dim): weight (E, E), bias (E,)
    w_out = jax.random.normal(kwo, (embed_dim, embed_dim), dtype=jnp.float32) * 0.1
    b_out = jax.random.normal(kbo, (embed_dim,), dtype=jnp.float32) * 0.1

    y = multi_head_attention(x, w_in, b_in, w_out, b_out, num_heads=num_heads)
    y = jax.block_until_ready(y)

    y_ref = _reference(x, w_in, b_in, w_out, b_out, num_heads=num_heads)
    # bf16 MXU operands with f32 accumulation; softmax math and normalization exact in f32.
    assert jnp.allclose(y, y_ref, atol=2e-2, rtol=2e-2), "mismatch vs reference"

    print("KERNEL_OK")
</pallas_src>

<mosaic_0001>
module attributes {stable_mosaic.version = 11 : i64} {
  func.func @_linear_kernel(%arg0: i32, %arg1: i32, %arg2: memref<16x32xf32, #tpu.memory_space<vmem>>, %arg3: memref<32x32xbf16, #tpu.memory_space<vmem>>, %arg4: memref<1x1x32xf32, #tpu.memory_space<vmem>>, %arg5: memref<1x16x32xbf16, #tpu.memory_space<vmem>>) attributes {dimension_semantics = [#tpu.dimension_semantics<parallel>, #tpu.dimension_semantics<parallel>], iteration_bounds = array<i64: 1, 3>, scalar_prefetch = 0 : i64, scratch_operands = 0 : i64, tpu.core_type = #tpu.core_type<tc>, window_params = [{transform_indices = @transform_0, window_bounds = array<i64: 16, 32>}, {transform_indices = @transform_1, window_bounds = array<i64: 32, 32>}, {transform_indices = @transform_2, window_bounds = array<i64: 1, 1, 32>}, {transform_indices = @transform_3, window_bounds = array<i64: 1, 16, 32>}]} {
    %c0 = arith.constant 0 : index
    %c0_0 = arith.constant 0 : index
    %0 = vector.load %arg2[%c0, %c0_0] : memref<16x32xf32, #tpu.memory_space<vmem>>, vector<16x32xf32>
    %1 = arith.truncf %0 : vector<16x32xf32> to vector<16x32xbf16>
    %c0_1 = arith.constant 0 : index
    %c0_2 = arith.constant 0 : index
    %2 = vector.load %arg3[%c0_1, %c0_2] : memref<32x32xbf16, #tpu.memory_space<vmem>>, vector<32x32xbf16>
    %cst = arith.constant dense<0.000000e+00> : vector<16x32xf32>
    %3 = tpu.matmul %1, %2, %cst {dimension_numbers = #tpu.dot_dimension_numbers<[1], [1], [0], [0], [0, 0, 1, 0], [], []>} : vector<16x32xbf16>, vector<32x32xbf16>, vector<16x32xf32> -> vector<16x32xf32>
    %c0_3 = arith.constant 0 : index
    %c0_4 = arith.constant 0 : index
    %c0_5 = arith.constant 0 : index
    %4 = vector.load %arg4[%c0_3, %c0_4, %c0_5] : memref<1x1x32xf32, #tpu.memory_space<vmem>>, vector<1x1x32xf32>
    %5 = vector.shape_cast %4 : vector<1x1x32xf32> to vector<1x32xf32>
    %6 = vector.broadcast %5 : vector<1x32xf32> to vector<16x32xf32>
    %7 = arith.addf %3, %6 : vector<16x32xf32>
    %8 = arith.truncf %7 : vector<16x32xf32> to vector<16x32xbf16>
    %c0_6 = arith.constant 0 : index
    %c0_7 = arith.constant 0 : index
    %c0_8 = arith.constant 0 : index
    %9 = vector.load %arg5[%c0_6, %c0_7, %c0_8] : memref<1x16x32xbf16, #tpu.memory_space<vmem>>, vector<1x16x32xbf16>
    %10 = vector.shape_cast %9 : vector<1x16x32xbf16> to vector<16x32xbf16>
    %11 = vector.shape_cast %8 : vector<16x32xbf16> to vector<1x16x32xbf16>
    tpu.vector_store %arg5[%c0_6, %c0_7, %c0_8], %11 {strides = array<i32>} : memref<1x16x32xbf16, #tpu.memory_space<vmem>>, vector<1x16x32xbf16>,
    return
  }
  func.func @transform_0(%arg0: i32, %arg1: i32) -> (i32, i32) {
    %c0_i32 = arith.constant 0 : i32
    %c0_i32_0 = arith.constant 0 : i32
    return %arg0, %c0_i32 : i32, i32
  }
  func.func @transform_1(%arg0: i32, %arg1: i32) -> (i32, i32) {
    %c0_i32 = arith.constant 0 : i32
    %c0_i32_0 = arith.constant 0 : i32
    return %arg1, %c0_i32 : i32, i32
  }
  func.func @transform_2(%arg0: i32, %arg1: i32) -> (i32, i32, i32) {
    %c0_i32 = arith.constant 0 : i32
    %c0_i32_0 = arith.constant 0 : i32
    %c0_i32_1 = arith.constant 0 : i32
    return %arg1, %c0_i32, %c0_i32_0 : i32, i32, i32
  }
  func.func @transform_3(%arg0: i32, %arg1: i32) -> (i32, i32, i32) {
    %c0_i32 = arith.constant 0 : i32
    %c0_i32_0 = arith.constant 0 : i32
    return %arg1, %arg0, %c0_i32 : i32, i32, i32
  }
}

</mosaic_0001>

<bundles_post_ra>
// kernel: tpu_custom_call.1
= control target key start
LH: loop header
LB: loop body
LE: loop exit
PB: predicated region body
PF: predicated region fallthrough
CT: control target
= control target key end

     0   :  { %8 = vsyncpa [#allocation3], 0  ;;  %s681_s0 = inlined_call_operand.vmem [shape: f32[16,32], index: 0, kind: input, shape index: {}]   ;;  %s682_s1 = inlined_call_operand.vmem [shape: bf16[96,32], index: 1, kind: input, shape index: {}]   ;;  %s683_s2 = inlined_call_operand.vmem [shape: f32[3,1,32], index: 2, kind: input, shape index: {}]   ;;  %s684_s3 = inlined_call_operand.hbm [shape: bf16[3,16,32], index: 3, kind: output, shape index: {}]  }
   0x1   :  { %10 = vsyncpa [#allocation3 + $0x1], 0  ;;  %s574_s12 = smov 0   ;;  %s576_s13 = smov 0  }
   0x2   :  { %s578_s14 = smov 0   ;;  %s580_s15 = smov 0  }
   0x3   :  { %s582_s16 = smov 0   ;;  %s584_s17 = smov 0  }
   0x4 LB: > { %s388_s18 = sadd.s32 4294967295, %s550_s17   ;;  %s389_s19 = sadd.s32 4294967294, %s550_s17   ;;  %s550_s17 = sphi %s584_s17, %s16_s17   ;;  %s546_s16 = sphi %s582_s16, %s691_s16   ;;  %s542_s15 = sphi %s580_s15, %s690_s15   ;;  %s538_s14 = sphi %s578_s14, %s689_s14   ;;  %s534_s13 = sphi %s576_s13, %s688_s13   ;;  %s530_s12 = sphi %s574_s12, %s687_s12  }
   0x5   : > { %s25_s20 = sadd.s32 1, %s546_s16  ;;  %s115_s21 = sadd.s32 1, %s538_s14 }
   0x6   : > { %p26_p0 = scmp.ge.s32.totalorder %s25_s20, 3  ;;  %p125_p1 = scmp.ne.s32.totalorder %s538_s14, %s534_s13 }
   0x7   : > { %p126_p2 = scmp.eq.s32.totalorder %s388_s18, 2  ;;  %p131_p3 = scmp.ne.s32.totalorder %s534_s13, %s530_s12 }
   0x8   : > { %s693_s20 = smov (%p26_p0, %s25_s20), 0  ;;  %p132_p5 = scmp.eq.s32.totalorder %s389_s19, 2 }
   0x9   : > { %p614_p4 = por %p126_p2, %p125_p1  ;;  %s110_s23 = ssub.s32 %s546_s16, %s693_s20 }
   0xa   : > { %p393_p6 = scmp.ge.s32.totalorder %s550_s17, 1  ;;  %p113_p7 = scmp.eq.s32.totalorder %s110_s23, 0 }
   0xb   : > { %p621_p8 = por %p132_p5, %p131_p3  ;;  %p174_p9 = scmp.lt.s32.totalorder %s550_s17, 4 }
   0xc   : > { %s627_s25 = scalar_select %p113_p7, %s538_s14, %s115_s21  }
   0xd   : > { %p175_p10 = pnand %p393_p6, %p174_p9 }
   0xe   : > { %s395_s26 = sshll.u32 (!%p175_p10), %s542_s15, 2  ;;  %p218_p12 = scmp.lt.s32.totalorder (!%p175_p10), %s542_s15, 2 }
   0xf   : > { %178 = sbr.rel (%p175_p10) target bundleno = 183 (0xb7), region = 32  ;;  %p213_p11 = scmp.lt.s32.totalorder (!%p175_p10), %s395_s26, 11 }
  0x10   : > { %s203_s18 = sand.u32 (!%p175_p10), 1, %s534_s13   ;;  %s413_s21 = sshll.u32 (!%p175_p10), %s542_s15, 3 }
  0x11   : > { %s394_s19 = sshll.u32 (!%p175_p10), %s203_s18, 3  ;;  %s492_s8 = scalar_lea.hbm (!%p175_p10), %s684_s3, 24 }
  0x14   : > { %s695_s26 = smov (!%p213_p11, %s395_s26), 11  ;;  %vm244_vm0 = vcmask 261120   ;;  %v223_v4 = vld [vmem:[%s681_s0] sm:$0xff]  ;;  %v224_v5 = vld [vmem:[%s681_s0 + $0x8] sm:$0xff]  ;;  %vm270_vm1 = vcmask 257024  }
  0x15   : > { %s219_s27 = scalar_select %p218_p12, %s542_s15, 2  ;;  %v225_v6 = vpack.c.bf16 %v224_v5, %v223_v4 }
  0x16   : > { %s396_s28 = sshll.u32 %s695_s26, 2 }
  0x17   : > { %s216_s4 = scalar_lea.vmem %s682_s1, %s396_s28  ;;  %s220_s7 = scalar_lea.vmem %s683_s2, %s219_s27 }
  0x18   : > { %v412_v0 = vld [vmem:[%s216_s4 + $0x8] sm:$0xff]  ;;  %v411_v2 = vld [vmem:[%s216_s4] sm:$0xff]  ;;  %s287_s27 = scalar_lea.hbm %s684_s3, %s413_s21  ;;  %s205_s28 = scalar_lea.vmem [#allocation2], %s394_s19 }
  0x19   : > { %v252_v1 = vsel %vm244_vm0, %v412_v0, 0  ;;  %v249_v3 = vsel %vm244_vm0, %v411_v2, 0  ;;  %v471_v7 = vld [vmem:[%s220_s7] ss:$0 sm:$0xff]  ;;  %s288_s29 = sshll.u32 %s205_s28, 4  ;;  %s290_s30 = sshll.u32 %s287_s27, 4  ;;  %s289_s29 = int_to_ptr.vmem [resolvable:$true] %s288_s29  ;;  %s291_s30 = int_to_ptr.hbm [resolvable:$true] %s290_s30 }
  0x1a   : > { %260 = vmatpush.bf16.xpose.msra.mxu0 %v252_v1  ;;  %s274_s4 = scalar_lea.sflag [#allocation3], %s203_s18  ;;  %s486_s5 = sshra.s32 %s291_s30, 4  ;;  %s487_s5 = int_to_ptr.hbm [resolvable:$true] %s486_s5 }
  0x1b   : > { %s488_s15 = scalar_lea.hbm %s487_s5, 8  ;;  %p493_p2 = scmp.lt.s32.totalorder %s487_s5, %s684_s3 }
  0x1c   : > { %p489_p13 = scmp.ne.s32.totalorder %s487_s5, %s488_s15  ;;  %p494_p3 = scmp.lt.s32.totalorder %s492_s8, %s488_s15 }
  0x1e   : > { %p490_p0 = pnand %p489_p13, %p614_p4  ;;  %p495_p5 = por %p494_p3, %p493_p2 }
  0x20   : > { %p491_p1 = pneg %p490_p0 }
  0x22   : > { %261 = vmatpush.bf16.xpose.msra.mxu0 %v249_v3  ;;  %p496_p6 = pnand %p495_p5, %p491_p1 }
  0x29   : > { %405 = vmatmul.msk.bf16.vlgmr.msra.gmra.mxu0 %vm244_vm0, %v225_v6 }
  0xa6   : > { %v263_v8 = vpop.f32.mrf.mxu0 }
  0xa7   : > { %v264_v9 = vadd.f32 %v471_v7, %v263_v8 }
  0xa9   : > { %v268_v10 = vpack.c.bf16 %v264_v9, %v264_v9 }
  0xab   : > { %271 = vst.msk [vmem:[%s205_s28] sm:$0xf] %vm270_vm1, %v268_v10 }
  0xae   : > { %v265_v11 = vpop.f32.mrf.mxu0 }
  0xaf   : > { %v266_v12 = vadd.f32 %v471_v7, %v265_v11 }
  0xb1   : > { %v269_v13 = vpack.c.bf16 %v266_v12, %v266_v12 }
  0xb3   : > { %272 = vst.msk [vmem:[%s205_s28 + $0x4] sm:$0xf] %vm270_vm1, %v269_v13 }
  0xb4   : > { %499 = shalt.err (!%p496_p6)
}
  0xb5   : > { %s552_s11 = smov 64   ;;  %s553_s18 = smov 4  }
  0xb6   : > { %414 = dma.vmem_to_hbm [thread:$0]  (%p614_p4), %s289_s29, 128, %s291_s30, %s274_s4, %s552_s11, %s552_s11, %s553_s18  }
  0xb7 PF: > { %p420_p7 = scmp.ge.s32.totalorder %s550_s17, 2  ;;  %s305_s19 = sand.u32 1, %s530_s12  }
  0xb8   : > { %s306_s21 = scalar_lea.sflag [#allocation3], %s305_s19 }
  0xb9   : > { %p417_p9 = pnand %p420_p7, %p621_p8 }
  0xbb   : > { %p418_p10 = pneg %p417_p9 }
  0xbd   : > { %525 = dma.done.wait (%p418_p10), %s306_s21, 128  }
  0xbe   : > { %527 = vsyncadd (%p418_p10), %s306_s21, 4294967168  ;;  %s16_s17 = sadd.s32 1, %s550_s17   ;;  %s687_s12 = smov %s534_s13 }
  0xbf   : > { %p13_p11 = scmp.ge.s32.totalorder %s16_s17, 5   ;;  %s688_s13 = smov %s538_s14 }
  0xc0   : > { %s689_s14 = smov %s627_s25  ;;  %s690_s15 = smov %s546_s16 }
  0xc1   : > { %s691_s16 = smov %s693_s20  ;;  %15 = sbr.rel (!%p13_p11) target bundleno = 4 (0x4), region = 73 }
  0xc6   :  { %312 = vsyncpa [#allocation3], 1 }
  0xc7   :  { %314 = vsyncpa [#allocation3 + $0x1], 1 }

</bundles_post_ra>
